<compile_context>
chip_gen: v7x
topology: tpu7x:2x2x1
jax: 0.10.0
libtpu: 0.0.40
codegen_flags: <defaults>
</compile_context>

<pallas_src>
import numpy as np
import jax
import jax.numpy as jnp
from jax.experimental import pallas as pl
from jax.experimental.pallas import tpu as pltpu


def _round_up(x, m):
    return (x + m - 1) // m * m


def _cdiv(a, b):
    return (a + b - 1) // b


BN_EPS = 1e-5  # nn.BatchNorm2d default


def _vmem_limit(tile_footprint_bytes):
    """Scoped-VMEM request derived from the real tile footprint (+ headroom).

    Clamped to [16 MiB, 32 MiB]: safe on v5e/v6e (128 MiB physical) and leaves
    headroom on v7x (64 MiB per TensorCore) instead of requesting all of it.
    """
    return int(min(max(4 * tile_footprint_bytes, 16 * 1024 * 1024),
                   32 * 1024 * 1024))


# ----------------------------------------------------------------------------
# Pallas kernel 1: tiled MXU matmul + bias (+ fused activation / fused BN stats)
# ----------------------------------------------------------------------------

def matmul_bias_act(a, b, bias, act="none", compute_stats=False):
    """act(a @ b + bias) with optionally fused per-column sum / sum-of-squares.

    a: (M, K) bf16, b: (K, Np) bf16 with Np % 128 == 0, bias: (Np,) f32.
    Returns f32 (M, Np); with compute_stats also returns per-M-tile column sums
    and sums-of-squares of the *pre-activation* value, shapes (gM, Np) each.
    """
    M, K = a.shape
    K2, Np = b.shape
    assert K == K2 and Np % 128 == 0
    assert K <= 1024 or K % 512 == 0  # caller pads K when it must be tiled

    # --- tile selection (lane-dense N; no operand masking; no tile splitting) -
    if Np <= 1024:
        TN = Np                      # gN == 1: A is streamed from HBM only once
    elif Np % 256 == 0:
        TN = 256
    else:
        TN = 128
    TM = 256 if M >= 256 else M      # full extent for small M -> no edge tile
    TK = K if K <= 1024 else 512     # single K step for typical conv fan-ins
    gM, gN, gK = _cdiv(M, TM), _cdiv(N := Np, TN), _cdiv(K, TK)
    m_partial = (M % TM) != 0        # static; only possible when M >= 256

    bias2 = bias.reshape(1, Np).astype(jnp.float32)

    def kernel(a_ref, b_ref, bias_ref, o_ref, *rest):
        if compute_stats:
            sum_ref, sq_ref, acc_ref = rest
        else:
            (acc_ref,) = rest
        k = pl.program_id(2)

        @pl.when(k == 0)
        def _():
            acc_ref[...] = jnp.zeros_like(acc_ref)

        acc_ref[...] += jnp.dot(a_ref[...], b_ref[...],
                                preferred_element_type=jnp.float32)

        @pl.when(k == gK - 1)
        def _():
            v = acc_ref[...] + bias_ref[...]
            if compute_stats:
                # Per-channel sum / sum^2 of the pre-activation conv output,
                # produced here so no extra HBM pass is needed for BN stats.
                if m_partial:
                    # Exclude garbage rows of the (single) partial M tile.
                    i = pl.program_id(0)
                    rows = jax.lax.broadcasted_iota(jnp.int32, v.shape, 0)
                    vz = jnp.where(rows < (M - i * TM), v, 0.0)
                else:
                    vz = v
                sum_ref[...] = jnp.sum(vz, axis=0, keepdims=True)
                sq_ref[...] = jnp.sum(vz * vz, axis=0, keepdims=True)
            if act == "relu":
                v = jnp.maximum(v, 0.0)
            elif act == "leakyrelu":
                v = jnp.where(v >= 0, v, 0.2 * v)
            o_ref[...] = v.astype(o_ref.dtype)

    # Deeper buffering on the K-streamed operands only when K is actually tiled.
    if gK >= 2:
        a_spec = pl.BlockSpec((TM, TK), lambda i, j, k: (i, k),
                              pipeline_mode=pl.Buffered(3))
        b_spec = pl.BlockSpec((TK, TN), lambda i, j, k: (k, j),
                              pipeline_mode=pl.Buffered(3))
        nbuf = 3
    else:
        a_spec = pl.BlockSpec((TM, TK), lambda i, j, k: (i, k))
        b_spec = pl.BlockSpec((TK, TN), lambda i, j, k: (k, j))
        nbuf = 2

    out_shapes = [jax.ShapeDtypeStruct((M, Np), jnp.float32)]
    out_specs = [pl.BlockSpec((TM, TN), lambda i, j, k: (i, j))]
    if compute_stats:
        out_shapes += [jax.ShapeDtypeStruct((gM, Np), jnp.float32)] * 2
        out_specs += [pl.BlockSpec((1, TN), lambda i, j, k: (i, j))] * 2

    tile_bytes = (nbuf * (TM * TK * a.dtype.itemsize + TK * TN * b.dtype.itemsize)
                  + 2 * TN * 4                          # bias
                  + 2 * TM * TN * 4                     # output double buffer
                  + (2 * 2 * TN * 4 if compute_stats else 0)
                  + TM * TN * 4)                        # f32 accumulator scratch

    grid_spec = pltpu.PrefetchScalarGridSpec(
        num_scalar_prefetch=0,
        grid=(gM, gN, gK),
        in_specs=[a_spec, b_spec,
                  pl.BlockSpec((1, TN), lambda i, j, k: (0, j))],
        out_specs=out_specs if compute_stats else out_specs[0],
        scratch_shapes=[pltpu.VMEM((TM, TN), jnp.float32)],
    )
    return pl.pallas_call(
        kernel,
        out_shape=tuple(out_shapes) if compute_stats else out_shapes[0],
        grid_spec=grid_spec,
        compiler_params=pltpu.CompilerParams(
            dimension_semantics=("parallel", "parallel", "arbitrary"),
            vmem_limit_bytes=_vmem_limit(tile_bytes)),
    )(a, b, bias2)


# ----------------------------------------------------------------------------
# Pallas kernel 2: lane-dense, row-tiled BatchNorm-affine + activation
# ----------------------------------------------------------------------------

def bn_act(x, scale, shift, act="relu"):
    """y = act(x * scale + shift); x: (M, Np) f32 with Np % 128 == 0 (lane-dense)."""
    M, Np = x.shape
    assert Np % 128 == 0
    sc = scale.reshape(1, Np).astype(jnp.float32)
    sh = shift.reshape(1, Np).astype(jnp.float32)

    # ~2 MiB f32 blocks (memory-bound roofline wants large tiles); full extent
    # for small M -> no edge tile, no tile-splitting heuristics.
    TR = max(8, min(M, (2 * 1024 * 1024) // (Np * 4)))
    TR = M if TR >= M else (TR // 8) * 8
    grid = (_cdiv(M, TR),)

    def kernel(x_ref, sc_ref, sh_ref, o_ref):
        v = x_ref[...] * sc_ref[...] + sh_ref[...]
        if act == "relu":
            v = jnp.maximum(v, 0.0)
        elif act == "leakyrelu":
            v = jnp.where(v >= 0, v, 0.2 * v)
        o_ref[...] = v

    tile_bytes = 2 * (2 * TR * Np * 4) + 2 * (2 * Np * 4)
    return pl.pallas_call(
        kernel,
        out_shape=jax.ShapeDtypeStruct((M, Np), jnp.float32),
        grid=grid,
        in_specs=[pl.BlockSpec((TR, Np), lambda i: (i, 0)),
                  pl.BlockSpec((1, Np), lambda i: (0, 0)),
                  pl.BlockSpec((1, Np), lambda i: (0, 0))],
        out_specs=pl.BlockSpec((TR, Np), lambda i: (i, 0)),
        compiler_params=pltpu.CompilerParams(
            dimension_semantics=("parallel",),
            vmem_limit_bytes=_vmem_limit(tile_bytes)),
    )(x, sc, sh)


# ----------------------------------------------------------------------------
# Conv glue: bf16 im2col feeding the Pallas matmul kernel (N padded to 128)
# ----------------------------------------------------------------------------

def conv2d_bias_act(x_nhwc, w, b, stride, padding, act="none", compute_stats=False):
    """Conv2d lowered to bf16 im2col + one Pallas matmul-with-epilogue kernel."""
    B, H, W, Cin = x_nhwc.shape
    kh, kw, _, Cout = w.shape
    Ho = (H + 2 * padding - kh) // stride + 1
    Wo = (W + 2 * padding - kw) // stride + 1
    Np = _round_up(Cout, 128)                    # lane-dense padded out channels

    xb = x_nhwc.astype(jnp.bfloat16)             # bf16 halves patch HBM traffic
    xp = jnp.pad(xb, ((0, 0), (padding, padding), (padding, padding), (0, 0)))
    # TODO(synk): replace the materialized im2col patch matrix with an in-kernel
    # strided gather (manual DMA over the padded NHWC input) to remove the
    # kh*kw/stride^2 read amplification on large activations.
    patches = [xp[:, di:di + Ho * stride:stride, dj:dj + Wo * stride:stride, :]
               for di in range(kh) for dj in range(kw)]
    a = jnp.stack(patches, axis=3).reshape(B * Ho * Wo, kh * kw * Cin)

    K = kh * kw * Cin
    wmat = w.reshape(K, Cout).astype(jnp.bfloat16)
    if K > 1024:
        # Zero-pad K once so the kernel never needs per-step operand masking.
        Kp = _round_up(K, 512)
        a = jnp.pad(a, ((0, 0), (0, Kp - K)))
        wmat = jnp.pad(wmat, ((0, Kp - K), (0, 0)))
    wmat = jnp.pad(wmat, ((0, 0), (0, Np - Cout)))          # zero output columns
    bias = jnp.pad(b.astype(jnp.float32), (0, Np - Cout))   # zero bias in the pad

    res = matmul_bias_act(a, wmat, bias, act=act, compute_stats=compute_stats)
    return res, (B, Ho, Wo, Cout, Np)


# ----------------------------------------------------------------------------
# BasicLayer forward
# ----------------------------------------------------------------------------

def basic_layer_forward(x, params, *, ksize=4, dstep=2, padding=1,
                        activation="relu", bn=True, training=True,
                        channels_last=False):
    """BasicLayer.forward: activation(BatchNorm2d(spectral_norm(Conv2d)(x))).

    channels_last=True keeps activations in NHWC so stacked layers can skip the
    per-layer NCHW<->NHWC transposes (do them once at the model boundary).
    """
    del ksize  # kernel size is carried by the weight shape
    if channels_last:
        x_nhwc = x.astype(jnp.float32)
    else:
        x_nhwc = jnp.transpose(x, (0, 2, 3, 1)).astype(jnp.float32)
    w, b = params["w"], params["b"]

    if bn and not training:
        # Eval-mode BN is a fixed per-channel affine -> fold into conv weight /
        # bias so conv + BN + activation is a single fused Pallas kernel.
        p = params["bn"]
        scale = p["gamma"] / jnp.sqrt(p["running_var"] + BN_EPS)
        shift = p["beta"] - p["running_mean"] * scale
        w_eff = w * scale[None, None, None, :]
        b_eff = b * scale + shift
        out, (B, Ho, Wo, Cout, Np) = conv2d_bias_act(
            x_nhwc, w_eff, b_eff, dstep, padding, act=activation)
    elif bn:
        # Train-mode BN: per-channel sum / sum-of-squares come out of the matmul
        # epilogue (no extra HBM pass), then one lane-dense affine + activation
        # kernel.  Padded channels are excluded from the statistics by slicing.
        (out, sums, sumsq), (B, Ho, Wo, Cout, Np) = conv2d_bias_act(
            x_nhwc, w, b, dstep, padding, act="none", compute_stats=True)
        p = params["bn"]
        count = float(B * Ho * Wo)
        mean = jnp.sum(sums, axis=0) / count                         # (Np,)
        var = jnp.maximum(jnp.sum(sumsq, axis=0) / count - mean * mean, 0.0)
        scale_c = p["gamma"] / jnp.sqrt(var[:Cout] + BN_EPS)
        shift_c = p["beta"] - mean[:Cout] * scale_c
        scale = jnp.zeros((Np,), jnp.float32).at[:Cout].set(scale_c)
        shift = jnp.zeros((Np,), jnp.float32).at[:Cout].set(shift_c)
        # TODO(synk): the (M, Np) intermediate could be written/read as bf16 to
        # halve HBM traffic on this memory-bound path; kept f32 for tolerance.
        out = bn_act(out, scale, shift, act=activation)
    else:
        out, (B, Ho, Wo, Cout, Np) = conv2d_bias_act(
            x_nhwc, w, b, dstep, padding, act=activation)

    out = out[:, :Cout].reshape(B, Ho, Wo, Cout)     # drop padded channels
    if channels_last:
        return out
    return jnp.transpose(out, (0, 3, 1, 2))          # NHWC -> NCHW


# ----------------------------------------------------------------------------
# Deterministic parameter construction
# ----------------------------------------------------------------------------

def _spectral_normalize(w, out_axis):
    """Exact spectral norm: divide by the largest singular value of the (out, fan_in) view."""
    # TODO(synk): PyTorch's spectral_norm re-estimates sigma with one power
    # iteration per forward call; here it is applied exactly once at init.
    w_np = np.asarray(w, dtype=np.float64)
    w2d = np.moveaxis(w_np, out_axis, 0).reshape(w_np.shape[out_axis], -1)
    sigma = np.linalg.svd(w2d, compute_uv=False)[0]
    return jnp.asarray(w_np / sigma, dtype=jnp.float32)


def init_params(key, ch_in, ch_out, ksize=4, bn=True):
    k_w, k_b, k_g, k_be, k_m, k_v = jax.random.split(key, 6)
    w = jax.random.normal(k_w, (ksize, ksize, ch_in, ch_out), jnp.float32) * 0.1
    w = _spectral_normalize(w, out_axis=3)
    b = jax.random.normal(k_b, (ch_out,), jnp.float32) * 0.01
    params = {"w": w, "b": b}
    if bn:
        params["bn"] = {
            "gamma": 1.0 + 0.1 * jax.random.normal(k_g, (ch_out,), jnp.float32),
            "beta": 0.1 * jax.random.normal(k_be, (ch_out,), jnp.float32),
            "running_mean": 0.1 * jax.random.normal(k_m, (ch_out,), jnp.float32),
            "running_var": 1.0 + 0.1 * jnp.abs(
                jax.random.normal(k_v, (ch_out,), jnp.float32)),
        }
    return params


# ----------------------------------------------------------------------------
# Pure-JAX reference (same bf16 rounding points as the kernel path)
# ----------------------------------------------------------------------------

def _reference_forward(x_nchw, params, *, dstep=2, padding=1,
                       activation="relu", bn=True, training=True):
    def _act(v):
        if activation == "relu":
            return jnp.maximum(v, 0.0)
        if activation == "leakyrelu":
            return jnp.where(v >= 0, v, 0.2 * v)
        return v

    w, b = params["w"], params["b"]
    if bn and not training:
        p = params["bn"]
        scale = p["gamma"] / jnp.sqrt(p["running_var"] + BN_EPS)
        shift = p["beta"] - p["running_mean"] * scale
        w = w * scale[None, None, None, :]
        b = b * scale + shift

    xb = x_nchw.astype(jnp.bfloat16).astype(jnp.float32)
    wb = w.astype(jnp.bfloat16).astype(jnp.float32)
    out = jax.lax.conv_general_dilated(
        xb, wb, window_strides=(dstep, dstep),
        padding=[(padding, padding), (padding, padding)],
        dimension_numbers=("NCHW", "HWIO", "NCHW"),
        precision=jax.lax.Precision.HIGHEST)
    out = out + b[None, :, None, None]

    if bn and training:
        p = params["bn"]
        mean = jnp.mean(out, axis=(0, 2, 3), keepdims=True)
        var = jnp.mean(jnp.square(out - mean), axis=(0, 2, 3), keepdims=True)
        out = (out - mean) / jnp.sqrt(var + BN_EPS)
        out = out * p["gamma"][None, :, None, None] + p["beta"][None, :, None, None]
    return _act(out)


# ----------------------------------------------------------------------------

if __name__ == "__main__":
    # BasicLayer(ch_in=4, ch_out=8, ksize=4, dstep=2, padding=1, activation='relu', bn=True)
    B, ch_in, H, W = 2, 4, 16, 16
    ch_out = 8

    key = jax.random.PRNGKey(0)
    k_param, k_x = jax.random.split(key)
    params = init_params(k_param, ch_in, ch_out, ksize=4, bn=True)
    x = jax.random.normal(k_x, (B, ch_in, H, W), jnp.float32)   # NCHW like PyTorch

    fwd_train = jax.jit(lambda xx, pp: basic_layer_forward(xx, pp, training=True))
    fwd_eval = jax.jit(lambda xx, pp: basic_layer_forward(xx, pp, training=False))

    # Train-mode forward (PyTorch module default: batch statistics).
    out_train = jax.block_until_ready(fwd_train(x, params))
    ref_train = jax.block_until_ready(_reference_forward(x, params, training=True))
    assert out_train.shape == (B, ch_out, H // 2, W // 2), out_train.shape
    assert bool(jnp.all(jnp.isfinite(out_train)))
    np.testing.assert_allclose(np.asarray(out_train), np.asarray(ref_train),
                               rtol=5e-3, atol=5e-3)

    # Eval-mode forward (running stats folded into the conv -> fully fused kernel).
    out_eval = jax.block_until_ready(fwd_eval(x, params))
    ref_eval = jax.block_until_ready(_reference_forward(x, params, training=False))
    assert out_eval.shape == (B, ch_out, H // 2, W // 2), out_eval.shape
    assert bool(jnp.all(jnp.isfinite(out_eval)))
    np.testing.assert_allclose(np.asarray(out_eval), np.asarray(ref_eval),
                               rtol=5e-3, atol=5e-3)

    print("KERNEL_OK")
</pallas_src>

<mosaic_0001>
module attributes {stable_mosaic.version = 11 : i64} {
  func.func @kernel(%arg0: i32, %arg1: i32, %arg2: i32, %arg3: memref<128x64xbf16, #tpu.memory_space<vmem>>, %arg4: memref<64x128xbf16, #tpu.memory_space<vmem>>, %arg5: memref<1x128xf32, #tpu.memory_space<vmem>>, %arg6: memref<128x128xf32, #tpu.memory_space<vmem>>, %arg7: memref<1x128xf32, #tpu.memory_space<vmem>>, %arg8: memref<1x128xf32, #tpu.memory_space<vmem>>, %arg9: memref<128x128xf32, #tpu.memory_space<vmem>>) attributes {dimension_semantics = [#tpu.dimension_semantics<parallel>, #tpu.dimension_semantics<parallel>, #tpu.dimension_semantics<arbitrary>], iteration_bounds = array<i64: 1, 1, 1>, scalar_prefetch = 0 : i64, scratch_operands = 1 : i64, tpu.core_type = #tpu.core_type<tc>, window_params = [{transform_indices = @transform_0, window_bounds = array<i64: 128, 64>}, {transform_indices = @transform_1, window_bounds = array<i64: 64, 128>}, {transform_indices = @transform_2, window_bounds = array<i64: 1, 128>}, {transform_indices = @transform_3, window_bounds = array<i64: 128, 128>}, {transform_indices = @transform_4, window_bounds = array<i64: 1, 128>}, {transform_indices = @transform_5, window_bounds = array<i64: 1, 128>}]} {
    %c0_i32 = arith.constant 0 : i32
    %0 = arith.cmpi eq, %arg2, %c0_i32 : i32
    %1 = arith.extui %0 : i1 to i32
    %c0_i32_0 = arith.constant 0 : i32
    %2 = arith.cmpi ne, %1, %c0_i32_0 : i32
    scf.if %2 {
      %cst_10 = arith.constant 0.000000e+00 : f32
      %12 = vector.broadcast %cst_10 : f32 to vector<128x128xf32>
      %c0_11 = arith.constant 0 : index
      %c0_12 = arith.constant 0 : index
      %13 = vector.load %arg9[%c0_11, %c0_12] : memref<128x128xf32, #tpu.memory_space<vmem>>, vector<128x128xf32>
      tpu.vector_store %arg9[%c0_11, %c0_12], %12 {strides = array<i32>} : memref<128x128xf32, #tpu.memory_space<vmem>>, vector<128x128xf32>,
    } else {
    }
    %c0 = arith.constant 0 : index
    %c0_1 = arith.constant 0 : index
    %3 = vector.load %arg9[%c0, %c0_1] : memref<128x128xf32, #tpu.memory_space<vmem>>, vector<128x128xf32>
    %c0_2 = arith.constant 0 : index
    %c0_3 = arith.constant 0 : index
    %4 = vector.load %arg3[%c0_2, %c0_3] : memref<128x64xbf16, #tpu.memory_space<vmem>>, vector<128x64xbf16>
    %c0_4 = arith.constant 0 : index
    %c0_5 = arith.constant 0 : index
    %5 = vector.load %arg4[%c0_4, %c0_5] : memref<64x128xbf16, #tpu.memory_space<vmem>>, vector<64x128xbf16>
    %cst = arith.constant dense<0.000000e+00> : vector<128x128xf32>
    %6 = tpu.matmul %4, %5, %cst {dimension_numbers = #tpu.dot_dimension_numbers<[1], [0], [0], [1], [0, 0, 1, 1], [], []>} : vector<128x64xbf16>, vector<64x128xbf16>, vector<128x128xf32> -> vector<128x128xf32>
    %7 = arith.addf %3, %6 : vector<128x128xf32>
    %c0_6 = arith.constant 0 : index
    %c0_7 = arith.constant 0 : index
    %8 = vector.load %arg9[%c0_6, %c0_7] : memref<128x128xf32, #tpu.memory_space<vmem>>, vector<128x128xf32>
    tpu.vector_store %arg9[%c0_6, %c0_7], %7 {strides = array<i32>} : memref<128x128xf32, #tpu.memory_space<vmem>>, vector<128x128xf32>,
    %c0_i32_8 = arith.constant 0 : i32
    %9 = arith.cmpi eq, %arg2, %c0_i32_8 : i32
    %10 = arith.extui %9 : i1 to i32
    %c0_i32_9 = arith.constant 0 : i32
    %11 = arith.cmpi ne, %10, %c0_i32_9 : i32
    scf.if %11 {
      %c0_10 = arith.constant 0 : index
      %c0_11 = arith.constant 0 : index
      %12 = vector.load %arg9[%c0_10, %c0_11] : memref<128x128xf32, #tpu.memory_space<vmem>>, vector<128x128xf32>
      %c0_12 = arith.constant 0 : index
      %c0_13 = arith.constant 0 : index
      %13 = vector.load %arg5[%c0_12, %c0_13] : memref<1x128xf32, #tpu.memory_space<vmem>>, vector<1x128xf32>
      %14 = vector.broadcast %13 : vector<1x128xf32> to vector<128x128xf32>
      %15 = arith.addf %12, %14 : vector<128x128xf32>
      %cst_14 = arith.constant dense<0.000000e+00> : vector<128xf32>
      %16 = vector.multi_reduction <add>, %15, %cst_14 [0] : vector<128x128xf32> to vector<128xf32>
      %17 = vector.shape_cast %16 : vector<128xf32> to vector<1x128xf32>
      %c0_15 = arith.constant 0 : index
      %c0_16 = arith.constant 0 : index
      %18 = vector.load %arg7[%c0_15, %c0_16] : memref<1x128xf32, #tpu.memory_space<vmem>>, vector<1x128xf32>
      tpu.vector_store %arg7[%c0_15, %c0_16], %17 {strides = array<i32>} : memref<1x128xf32, #tpu.memory_space<vmem>>, vector<1x128xf32>,
      %19 = arith.mulf %15, %15 : vector<128x128xf32>
      %cst_17 = arith.constant dense<0.000000e+00> : vector<128xf32>
      %20 = vector.multi_reduction <add>, %19, %cst_17 [0] : vector<128x128xf32> to vector<128xf32>
      %21 = vector.shape_cast %20 : vector<128xf32> to vector<1x128xf32>
      %c0_18 = arith.constant 0 : index
      %c0_19 = arith.constant 0 : index
      %22 = vector.load %arg8[%c0_18, %c0_19] : memref<1x128xf32, #tpu.memory_space<vmem>>, vector<1x128xf32>
      tpu.vector_store %arg8[%c0_18, %c0_19], %21 {strides = array<i32>} : memref<1x128xf32, #tpu.memory_space<vmem>>, vector<1x128xf32>,
      %c0_20 = arith.constant 0 : index
      %c0_21 = arith.constant 0 : index
      %23 = vector.load %arg6[%c0_20, %c0_21] : memref<128x128xf32, #tpu.memory_space<vmem>>, vector<128x128xf32>
      tpu.vector_store %arg6[%c0_20, %c0_21], %15 {strides = array<i32>} : memref<128x128xf32, #tpu.memory_space<vmem>>, vector<128x128xf32>,
    } else {
    }
    return
  }
  func.func @transform_0(%arg0: i32, %arg1: i32, %arg2: i32) -> (i32, i32) {
    %c0_i32 = arith.constant 0 : i32
    return %arg0, %arg2 : i32, i32
  }
  func.func @transform_1(%arg0: i32, %arg1: i32, %arg2: i32) -> (i32, i32) {
    %c0_i32 = arith.constant 0 : i32
    return %arg2, %arg1 : i32, i32
  }
  func.func @transform_2(%arg0: i32, %arg1: i32, %arg2: i32) -> (i32, i32) {
    %c0_i32 = arith.constant 0 : i32
    %c0_i32_0 = arith.constant 0 : i32
    return %c0_i32, %arg1 : i32, i32
  }
  func.func @transform_3(%arg0: i32, %arg1: i32, %arg2: i32) -> (i32, i32) {
    %c0_i32 = arith.constant 0 : i32
    return %arg0, %arg1 : i32, i32
  }
  func.func @transform_4(%arg0: i32, %arg1: i32, %arg2: i32) -> (i32, i32) {
    %c0_i32 = arith.constant 0 : i32
    return %arg0, %arg1 : i32, i32
  }
  func.func @transform_5(%arg0: i32, %arg1: i32, %arg2: i32) -> (i32, i32) {
    %c0_i32 = arith.constant 0 : i32
    return %arg0, %arg1 : i32, i32
  }
}

module attributes {stable_mosaic.version = 11 : i64} {
  func.func @kernel(%arg0: i32, %arg1: memref<128x128xf32, #tpu.memory_space<vmem>>, %arg2: memref<1x128xf32, #tpu.memory_space<vmem>>, %arg3: memref<1x128xf32, #tpu.memory_space<vmem>>, %arg4: memref<128x128xf32, #tpu.memory_space<vmem>>) attributes {dimension_semantics = [#tpu.dimension_semantics<parallel>], iteration_bounds = array<i64: 1>, scalar_prefetch = 0 : i64, scratch_operands = 0 : i64, tpu.core_type = #tpu.core_type<tc>, window_params = [{transform_indices = @transform_0, window_bounds = array<i64: 128, 128>}, {pipeline_mode = #tpu.pipeline_mode<synchronous>, transform_indices = @transform_1, window_bounds = array<i64: 1, 128>}, {pipeline_mode = #tpu.pipeline_mode<synchronous>, transform_indices = @transform_2, window_bounds = array<i64: 1, 128>}, {transform_indices = @transform_3, window_bounds = array<i64: 128, 128>}]} {
    %c0 = arith.constant 0 : index
    %c0_0 = arith.constant 0 : index
    %0 = vector.load %arg1[%c0, %c0_0] : memref<128x128xf32, #tpu.memory_space<vmem>>, vector<128x128xf32>
    %c0_1 = arith.constant 0 : index
    %c0_2 = arith.constant 0 : index
    %1 = vector.load %arg2[%c0_1, %c0_2] : memref<1x128xf32, #tpu.memory_space<vmem>>, vector<1x128xf32>
    %2 = vector.broadcast %1 : vector<1x128xf32> to vector<128x128xf32>
    %3 = arith.mulf %0, %2 : vector<128x128xf32>
    %c0_3 = arith.constant 0 : index
    %c0_4 = arith.constant 0 : index
    %4 = vector.load %arg3[%c0_3, %c0_4] : memref<1x128xf32, #tpu.memory_space<vmem>>, vector<1x128xf32>
    %5 = vector.broadcast %4 : vector<1x128xf32> to vector<128x128xf32>
    %6 = arith.addf %3, %5 : vector<128x128xf32>
    %cst = arith.constant 0.000000e+00 : f32
    %7 = vector.broadcast %cst : f32 to vector<128x128xf32>
    %8 = arith.maximumf %6, %7 : vector<128x128xf32>
    %c0_5 = arith.constant 0 : index
    %c0_6 = arith.constant 0 : index
    %9 = vector.load %arg4[%c0_5, %c0_6] : memref<128x128xf32, #tpu.memory_space<vmem>>, vector<128x128xf32>
    tpu.vector_store %arg4[%c0_5, %c0_6], %8 {strides = array<i32>} : memref<128x128xf32, #tpu.memory_space<vmem>>, vector<128x128xf32>,
    return
  }
  func.func @transform_0(%arg0: i32) -> (i32, i32) {
    %c0_i32 = arith.constant 0 : i32
    %c0_i32_0 = arith.constant 0 : i32
    return %arg0, %c0_i32 : i32, i32
  }
  func.func @transform_1(%arg0: i32) -> (i32, i32) {
    %c0_i32 = arith.constant 0 : i32
    %c0_i32_0 = arith.constant 0 : i32
    %c0_i32_1 = arith.constant 0 : i32
    return %c0_i32, %c0_i32_0 : i32, i32
  }
  func.func @transform_2(%arg0: i32) -> (i32, i32) {
    %c0_i32 = arith.constant 0 : i32
    %c0_i32_0 = arith.constant 0 : i32
    %c0_i32_1 = arith.constant 0 : i32
    return %c0_i32, %c0_i32_0 : i32, i32
  }
  func.func @transform_3(%arg0: i32) -> (i32, i32) {
    %c0_i32 = arith.constant 0 : i32
    %c0_i32_0 = arith.constant 0 : i32
    return %arg0, %c0_i32 : i32, i32
  }
}

</mosaic_0001>

<bundles_post_ra>
// kernel: _lambda_.3
= control target key start
LH: loop header
LB: loop body
LE: loop exit
PB: predicated region body
PF: predicated region fallthrough
CT: control target
= control target key end

     0   :  { %s254_s0 = inlined_call_operand.vmem [shape: f32[128,128], index: 0, kind: input, shape index: {}]   ;;  %s255_s1 = inlined_call_operand.vmem [shape: f32[1,128], index: 1, kind: input, shape index: {}]   ;;  %s256_s2 = inlined_call_operand.vmem [shape: f32[1,128], index: 2, kind: input, shape index: {}]   ;;  %s257_s3 = inlined_call_operand.vmem [shape: f32[128,128], index: 3, kind: output, shape index: {}]  }
   0x1   :  { %v14_v0 = vld [vmem:[%s254_s0] sm:$0xff]  ;;  %v15_v4 = vld [vmem:[%s254_s0 + $0x8] sm:$0xff]  ;;  %v16_v5 = vld [vmem:[%s254_s0 + $0x10] sm:$0xff] }
   0x2   :  { %v112_v1 = vld [vmem:[%s255_s1] ss:$0 sm:$0xff]  ;;  %v17_v6 = vld [vmem:[%s254_s0 + $0x18] sm:$0xff]  ;;  %v19_v11 = vld [vmem:[%s254_s0 + $0x28] sm:$0xff] }
   0x3   :  { %v143_v2 = vld [vmem:[%s256_s2] ss:$0 sm:$0xff]  ;;  %v37_v3 = vmul.f32 %v112_v1, %v14_v0  ;;  %v38_v7 = vmul.f32 %v112_v1, %v15_v4  ;;  %v39_v8 = vmul.f32 %v112_v1, %v16_v5  ;;  %v40_v9 = vmul.f32 %v112_v1, %v17_v6  ;;  %v20_v12 = vld [vmem:[%s254_s0 + $0x30] sm:$0xff]  ;;  %v21_v17 = vld [vmem:[%s254_s0 + $0x38] sm:$0xff] }
   0x4   :  { %v18_v10 = vld [vmem:[%s254_s0 + $0x20] sm:$0xff]  ;;  %v42_v15 = vmul.f32 %v112_v1, %v19_v11  ;;  %v43_v16 = vmul.f32 %v112_v1, %v20_v12  ;;  %v44_v21 = vmul.f32 %v112_v1, %v21_v17  ;;  %v23_v27 = vld [vmem:[%s254_s0 + $0x48] sm:$0xff]  ;;  %v24_v28 = vld [vmem:[%s254_s0 + $0x50] sm:$0xff] }
   0x5   :  { %v60_v13 = vadd.f32 %v143_v2, %v37_v3  ;;  %v41_v14 = vmul.f32 %v112_v1, %v18_v10  ;;  %v61_v18 = vadd.f32 %v143_v2, %v38_v7  ;;  %v62_v19 = vadd.f32 %v143_v2, %v39_v8  ;;  %v22_v22 = vld [vmem:[%s254_s0 + $0x40] sm:$0xff]  ;;  %v25_v29 = vld [vmem:[%s254_s0 + $0x58] sm:$0xff]  ;;  %v27_v35 = vld [vmem:[%s254_s0 + $0x68] sm:$0xff] }
   0x6   :  { %v63_v20 = vadd.f32 %v143_v2, %v40_v9  ;;  %v65_v25 = vadd.f32 %v143_v2, %v42_v15  ;;  %v66_v26 = vadd.f32 %v143_v2, %v43_v16  ;;  %v67_v33 = vadd.f32 %v143_v2, %v44_v21  ;;  %v26_v34 = vld [vmem:[%s254_s0 + $0x60] sm:$0xff]  ;;  %v28_v36 = vld [vmem:[%s254_s0 + $0x70] sm:$0xff]  ;;  %v29_v41 = vld [vmem:[%s254_s0 + $0x78] sm:$0xff] }
   0x7   :  { %v76_v23 = vmax.f32 %v60_v13, 0.0  ;;  %v64_v24 = vadd.f32 %v143_v2, %v41_v14  ;;  %v77_v30 = vmax.f32 %v61_v18, 0.0  ;;  %v78_v31 = vmax.f32 %v62_v19, 0.0 }
   0x8   :  { %v79_v32 = vmax.f32 %v63_v20, 0.0  ;;  %v81_v38 = vmax.f32 %v65_v25, 0.0  ;;  %v82_v39 = vmax.f32 %v66_v26, 0.0  ;;  %v45_v40 = vmul.f32 %v112_v1, %v22_v22 }
   0x9   :  { %92 = vst [vmem:[%s257_s3] sm:$0xff] %v76_v23  ;;  %v80_v37 = vmax.f32 %v64_v24, 0.0  ;;  %93 = vst [vmem:[%s257_s3 + $0x8] sm:$0xff] %v77_v30  ;;  %v83_v42 = vmax.f32 %v67_v33, 0.0  ;;  %v46_v43 = vmul.f32 %v112_v1, %v23_v27  ;;  %v47_v44 = vmul.f32 %v112_v1, %v24_v28 }
   0xa   :  { %94 = vst [vmem:[%s257_s3 + $0x10] sm:$0xff] %v78_v31  ;;  %95 = vst [vmem:[%s257_s3 + $0x18] sm:$0xff] %v79_v32  ;;  %v48_v45 = vmul.f32 %v112_v1, %v25_v29  ;;  %v68_v46 = vadd.f32 %v143_v2, %v45_v40  ;;  %v49_v47 = vmul.f32 %v112_v1, %v26_v34 }
   0xb   :  { %96 = vst [vmem:[%s257_s3 + $0x20] sm:$0xff] %v80_v37  ;;  %97 = vst [vmem:[%s257_s3 + $0x28] sm:$0xff] %v81_v38  ;;  %v50_v48 = vmul.f32 %v112_v1, %v27_v35  ;;  %v51_v49 = vmul.f32 %v112_v1, %v28_v36  ;;  %v69_v50 = vadd.f32 %v143_v2, %v46_v43 }
   0xc   :  { %98 = vst [vmem:[%s257_s3 + $0x30] sm:$0xff] %v82_v39  ;;  %99 = vst [vmem:[%s257_s3 + $0x38] sm:$0xff] %v83_v42  ;;  %v70_v51 = vadd.f32 %v143_v2, %v47_v44  ;;  %v71_v52 = vadd.f32 %v143_v2, %v48_v45  ;;  %v52_v53 = vmul.f32 %v112_v1, %v29_v41  ;;  %v84_v54 = vmax.f32 %v68_v46, 0.0 }
   0xd   :  { %v72_v55 = vadd.f32 %v143_v2, %v49_v47  ;;  %v73_v56 = vadd.f32 %v143_v2, %v50_v48  ;;  %v74_v57 = vadd.f32 %v143_v2, %v51_v49  ;;  %v85_v58 = vmax.f32 %v69_v50, 0.0 }
   0xe   :  { %v86_v59 = vmax.f32 %v70_v51, 0.0  ;;  %v87_v60 = vmax.f32 %v71_v52, 0.0  ;;  %v75_v61 = vadd.f32 %v143_v2, %v52_v53  ;;  %100 = vst [vmem:[%s257_s3 + $0x40] sm:$0xff] %v84_v54 }
   0xf   :  { %v88_v62 = vmax.f32 %v72_v55, 0.0  ;;  %v89_v63 = vmax.f32 %v73_v56, 0.0  ;;  %v90_v0 = vmax.f32 %v74_v57, 0.0  ;;  %101 = vst [vmem:[%s257_s3 + $0x48] sm:$0xff] %v85_v58 }
  0x10   :  { %102 = vst [vmem:[%s257_s3 + $0x50] sm:$0xff] %v86_v59  ;;  %103 = vst [vmem:[%s257_s3 + $0x58] sm:$0xff] %v87_v60  ;;  %v91_v1 = vmax.f32 %v75_v61, 0.0 }
  0x11   :  { %104 = vst [vmem:[%s257_s3 + $0x60] sm:$0xff] %v88_v62  ;;  %105 = vst [vmem:[%s257_s3 + $0x68] sm:$0xff] %v89_v63 }
  0x12   :  { %106 = vst [vmem:[%s257_s3 + $0x70] sm:$0xff] %v90_v0  ;;  %107 = vst [vmem:[%s257_s3 + $0x78] sm:$0xff] %v91_v1 }

// kernel: _lambda_.2
= control target key start
LH: loop header
LB: loop body
LE: loop exit
PB: predicated region body
PF: predicated region fallthrough
CT: control target
= control target key end

     0   :  { %vm142_vm0 = vcmask 523264   ;;  %s646_s1 = inlined_call_operand.vmem [shape: bf16[64,128], index: 1, kind: input, shape index: {}]   ;;  %s647_s0 = inlined_call_operand.vmem [shape: bf16[128,64], index: 0, kind: input, shape index: {}]   ;;  %s648_s2 = inlined_call_operand.vmem [shape: f32[1,128], index: 2, kind: input, shape index: {}]   ;;  %s649_s3 = inlined_call_operand.vmem [shape: f32[128,128], index: 3, kind: output, shape index: {0}]   ;;  %s650_s4 = inlined_call_operand.vmem [shape: f32[1,128], index: 4, kind: output, shape index: {1}]   ;;  %s651_s5 = inlined_call_operand.vmem [shape: f32[1,128], index: 5, kind: output, shape index: {2}]  }
   0x1   :  { %v491_v0 = vld [vmem:[%s646_s1] sm:$0xff]   ;;  %v492_v1 = vld [vmem:[%s646_s1 + $0x8] sm:$0xff]   ;;  %v493_v2 = vld [vmem:[%s646_s1 + $0x10] sm:$0xff]  }
   0x2   :  { %459 = vmatprep.subr.bf16.mxu0 %v491_v0  ;;  %483 = vmatprep.subr.bf16.mxu1 %v491_v0  ;;  %v495_v3 = vld [vmem:[%s647_s0] sm:$0xff]   ;;  %v494_v4 = vld [vmem:[%s646_s1 + $0x18] sm:$0xff]   ;;  %v496_v6 = vld [vmem:[%s647_s0 + $0x8] sm:$0xff]  }
   0x3   :  { %460 = vmatpush3.bf16.msra.mxu0 %v491_v0  ;;  %487 = vmatpush3.bf16.msra.mxu1 %v491_v0  ;;  %v499_v5 = vld [vmem:[%s647_s0 + $0x20] sm:$0xff]   ;;  %v500_v7 = vld [vmem:[%s647_s0 + $0x28] sm:$0xff]   ;;  %v497_v8 = vld [vmem:[%s647_s0 + $0x10] sm:$0xff]  }
   0x4   :  { %461 = vmatprep.subr.bf16.mxu0 %v492_v1  ;;  %484 = vmatprep.subr.bf16.mxu1 %v492_v1  ;;  %v501_v9 = vld [vmem:[%s647_s0 + $0x30] sm:$0xff]   ;;  %v498_v10 = vld [vmem:[%s647_s0 + $0x18] sm:$0xff]   ;;  %v446_v12 = vld [vmem:[%s648_s2] ss:$0 sm:$0xff] }
   0x5   :  { %467 = vmatprep.mubr.msk.bf16.mxu0 %vm142_vm0, %v495_v3  ;;  %475 = vmatprep.mubr.msk.bf16.mxu1 %vm142_vm0, %v499_v5  ;;  %v502_v11 = vld [vmem:[%s647_s0 + $0x38] sm:$0xff]  }
   0x7   :  { %462 = vmatpush3.bf16.msra.mxu0 %v492_v1  ;;  %488 = vmatpush3.bf16.msra.mxu1 %v492_v1 }
   0x8   :  { %463 = vmatprep.subr.bf16.mxu0 %v493_v2  ;;  %485 = vmatprep.subr.bf16.mxu1 %v493_v2 }
   0xb   :  { %464 = vmatpush3.bf16.msra.mxu0 %v493_v2  ;;  %489 = vmatpush3.bf16.msra.mxu1 %v493_v2 }
   0xc   :  { %465 = vmatprep.subr.bf16.mxu0 %v494_v4  ;;  %486 = vmatprep.subr.bf16.mxu1 %v494_v4 }
   0xf   :  { %466 = vmatpush3.bf16.msra.mxu0 %v494_v4  ;;  %490 = vmatpush3.bf16.msra.mxu1 %v494_v4 }
  0x12   :  { %468 = vmatmul.mubr.msk.bf16.vlgmr.msra.gmra.mrb[0].mxu0 %vm142_vm0, %v496_v6  ;;  %476 = vmatmul.mubr.msk.bf16.vlgmr.msra.gmra.mrb[0].mxu1 %vm142_vm0, %v500_v7 }
  0x13   :  { %471 = vmatprep.mubr.msk.bf16.mxu0 %vm142_vm0, %v497_v8  ;;  %479 = vmatprep.mubr.msk.bf16.mxu1 %vm142_vm0, %v501_v9 }
  0x1a   :  { %472 = vmatmul.mubr.msk.bf16.gmra.mrb[4].mxu0 %vm142_vm0, %v498_v10  ;;  %480 = vmatmul.mubr.msk.bf16.gmra.mrb[4].mxu1 %vm142_vm0, %v502_v11 }
  0xe5   :  { %v469_v13 = vpop.f32.mrb[0].mxu0  ;;  %v477_v14 = vpop.f32.mrb[0].mxu1 }
  0xe6   :  { %v324_v15 = vadd.f32 %v469_v13, %v446_v12  ;;  %v201_v16 = vpop.f32.mrb[1].mxu0  ;;  %v580_v17 = vadd.f32 %v477_v14, %v446_v12  ;;  %v233_v18 = vpop.f32.mrb[1].mxu1 }
  0xe7   :  { %v322_v19 = vadd.f32 %v446_v12, %v201_v16  ;;  %v470_v20 = vpop.f32.mrb[2].mxu0  ;;  %v330_v21 = vadd.f32 %v446_v12, %v233_v18  ;;  %v478_v22 = vpop.f32.mrb[2].mxu1 }
  0xe8   :  { %400 = vst [vmem:[%s649_s3 + $0x10] sm:$0xff] %v324_v15  ;;  %v325_v23 = vadd.f32 %v470_v20, %v446_v12  ;;  %v204_v24 = vpop.f32.mrb[3].mxu0  ;;  %408 = vst [vmem:[%s649_s3 + $0x50] sm:$0xff] %v580_v17  ;;  %v589_v25 = vadd.f32 %v478_v22, %v446_v12  ;;  %v236_v26 = vpop.f32.mrb[3].mxu1  ;;  %v362_v32 = vmul.f32 %v324_v15, %v324_v15 }
  0xe9   :  { %398 = vst [vmem:[%s649_s3] sm:$0xff] %v322_v19  ;;  %v323_v27 = vadd.f32 %v446_v12, %v204_v24  ;;  %406 = vst [vmem:[%s649_s3 + $0x40] sm:$0xff] %v330_v21  ;;  %v331_v28 = vadd.f32 %v446_v12, %v236_v26  ;;  %v360_v29 = vmul.f32 %v322_v19, %v322_v19 }
  0xea   :  { %401 = vst [vmem:[%s649_s3 + $0x18] sm:$0xff] %v325_v23  ;;  %409 = vst [vmem:[%s649_s3 + $0x58] sm:$0xff] %v589_v25  ;;  %v363_v37 = vmul.f32 %v325_v23, %v325_v23  ;;  %v368_v2 = vmul.f32 %v330_v21, %v330_v21  ;;  %v370_v8 = vmul.f32 %v580_v17, %v580_v17 }
  0xeb   :  { %v338_v30 = vadd.f32 %v323_v27, %v322_v19  ;;  %v361_v31 = vmul.f32 %v323_v27, %v323_v27  ;;  %399 = vst [vmem:[%s649_s3 + $0x8] sm:$0xff] %v323_v27  ;;  %407 = vst [vmem:[%s649_s3 + $0x48] sm:$0xff] %v331_v28  ;;  %v369_v7 = vmul.f32 %v331_v28, %v331_v28 }
  0xec   :  { %v371_v11 = vmul.f32 %v589_v25, %v589_v25 }
  0xed   :  { %v339_v33 = vadd.f32 %v338_v30, %v324_v15  ;;  %v376_v34 = vadd.f32 %v361_v31, %v360_v29  ;;  %v473_v35 = vpop.f32.mrb[4].mxu0  ;;  %v481_v36 = vpop.f32.mrb[4].mxu1 }
  0xee   :  { %v328_v38 = vadd.f32 %v473_v35, %v446_v12  ;;  %v217_v39 = vpop.f32.mrb[5].mxu0  ;;  %v336_v40 = vadd.f32 %v481_v36, %v446_v12  ;;  %v249_v41 = vpop.f32.mrb[5].mxu1 }
  0xef   :  { %v377_v42 = vadd.f32 %v376_v34, %v362_v32  ;;  %v326_v43 = vadd.f32 %v446_v12, %v217_v39  ;;  %v340_v44 = vadd.f32 %v339_v33, %v325_v23  ;;  %v474_v45 = vpop.f32.mrb[6].mxu0  ;;  %v334_v46 = vadd.f32 %v446_v12, %v249_v41  ;;  %v482_v47 = vpop.f32.mrb[6].mxu1 }
  0xf0   :  { %404 = vst [vmem:[%s649_s3 + $0x30] sm:$0xff] %v328_v38  ;;  %v329_v48 = vadd.f32 %v474_v45, %v446_v12  ;;  %v220_v49 = vpop.f32.mrb[7].mxu0  ;;  %412 = vst [vmem:[%s649_s3 + $0x70] sm:$0xff] %v336_v40  ;;  %v337_v50 = vadd.f32 %v482_v47, %v446_v12  ;;  %v252_v51 = vpop.f32.mrb[7].mxu1  ;;  %v366_v60 = vmul.f32 %v328_v38, %v328_v38 }
  0xf1   :  { %v341_v52 = vadd.f32 %v340_v44, %v326_v43  ;;  %v364_v53 = vmul.f32 %v326_v43, %v326_v43  ;;  %v378_v54 = vadd.f32 %v377_v42, %v363_v37  ;;  %402 = vst [vmem:[%s649_s3 + $0x20] sm:$0xff] %v326_v43  ;;  %v327_v55 = vadd.f32 %v446_v12, %v220_v49 }
  0xf2   :  { %410 = vst [vmem:[%s649_s3 + $0x60] sm:$0xff] %v334_v46  ;;  %405 = vst [vmem:[%s649_s3 + $0x38] sm:$0xff] %v329_v48  ;;  %v335_v56 = vadd.f32 %v446_v12, %v252_v51  ;;  %v367_v63 = vmul.f32 %v329_v48, %v329_v48  ;;  %v372_v14 = vmul.f32 %v334_v46, %v334_v46 }
  0xf3   :  { %413 = vst [vmem:[%s649_s3 + $0x78] sm:$0xff] %v337_v50  ;;  %v379_v57 = vadd.f32 %v378_v54, %v364_v53  ;;  %v342_v58 = vadd.f32 %v341_v52, %v327_v55  ;;  %v365_v59 = vmul.f32 %v327_v55, %v327_v55  ;;  %403 = vst [vmem:[%s649_s3 + $0x28] sm:$0xff] %v327_v55 }
  0xf4   :  { %411 = vst [vmem:[%s649_s3 + $0x68] sm:$0xff] %v335_v56  ;;  %v373_v20 = vmul.f32 %v335_v56, %v335_v56  ;;  %v375_v24 = vmul.f32 %v337_v50, %v337_v50 }
  0xf5   :  { %v343_v61 = vadd.f32 %v342_v58, %v328_v38  ;;  %v380_v62 = vadd.f32 %v379_v57, %v365_v59 }
  0xf7   :  { %v381_v0 = vadd.f32 %v380_v62, %v366_v60  ;;  %v344_v1 = vadd.f32 %v343_v61, %v329_v48 }
  0xf9   :  { %v345_v3 = vadd.f32 %v344_v1, %v330_v21  ;;  %v382_v4 = vadd.f32 %v381_v0, %v367_v63  ;;  %v374_v21 = vmul.f32 %v336_v40, %v336_v40 }
  0xfb   :  { %v383_v5 = vadd.f32 %v382_v4, %v368_v2  ;;  %v346_v6 = vadd.f32 %v345_v3, %v331_v28 }
  0xfd   :  { %v347_v9 = vadd.f32 %v346_v6, %v580_v17  ;;  %v384_v10 = vadd.f32 %v383_v5, %v369_v7 }
  0xff   :  { %v385_v12 = vadd.f32 %v384_v10, %v370_v8  ;;  %v348_v13 = vadd.f32 %v347_v9, %v589_v25 }
 0x101   :  { %v349_v15 = vadd.f32 %v348_v13, %v334_v46  ;;  %v386_v16 = vadd.f32 %v385_v12, %v371_v11 }
 0x103   :  { %v387_v18 = vadd.f32 %v386_v16, %v372_v14  ;;  %v350_v19 = vadd.f32 %v349_v15, %v335_v56 }
 0x105   :  { %v351_v22 = vadd.f32 %v350_v19, %v336_v40  ;;  %v388_v23 = vadd.f32 %v387_v18, %v373_v20 }
 0x107   :  { %v352_v26 = vadd.f32 %v351_v22, %v337_v50  ;;  %v389_v27 = vadd.f32 %v388_v23, %v374_v21 }
 0x109   :  { %v353_v17 = vrot.slane %v352_v26, 4  ;;  %v390_v28 = vadd.f32 %v389_v27, %v375_v24 }
 0x10b   :  { %v354_v29 = vadd.f32 %v353_v17, %v352_v26  ;;  %v391_v30 = vrot.slane %v390_v28, 4 }
 0x10d   :  { %v355_v31 = vrot.slane %v354_v29, 2  ;;  %v392_v32 = vadd.f32 %v391_v30, %v390_v28 }
 0x10f   :  { %v356_v33 = vadd.f32 %v355_v31, %v354_v29  ;;  %v393_v25 = vrot.slane %v392_v32, 2 }
 0x111   :  { %v357_v34 = vrot.slane %v356_v33, 1  ;;  %v394_v35 = vadd.f32 %v393_v25, %v392_v32 }
 0x113   :  { %v358_v36 = vadd.f32 %v357_v34, %v356_v33  ;;  %v395_v37 = vrot.slane %v394_v35, 1 }
 0x115   :  { %359 = vst [vmem:[%s650_s4] sm:$0x1] %v358_v36  ;;  %v396_v38 = vadd.f32 %v395_v37, %v394_v35 }
 0x117   :  { %397 = vst [vmem:[%s651_s5] sm:$0x1] %v396_v38 }

</bundles_post_ra>
